<compile_context>
chip_gen: v7x
topology: tpu7x:2x2x1
jax: 0.10.0
libtpu: 0.0.40
codegen_flags: <defaults>
</compile_context>

<pallas_src>
import functools

import jax
import jax.numpy as jnp
from jax import lax
from jax.experimental import pallas as pl
from jax.experimental.pallas import tpu as pltpu

IN_DIM = 45
HID3 = 30
OUT_DIM = 1


def _round_up(n, m):
    return ((n + m - 1) // m) * m


def _pad2d(a, rows, cols):
    r, c = a.shape
    return jnp.pad(a, ((0, rows - r), (0, cols - c)))


def mlp_kernel(x_ref, w1_ref, b1_ref, w2_ref, b2_ref, w3_ref, b3_ref,
               w4t_ref, b4_ref, o_ref):
    # Fused 4-layer MLP forward for one batch tile. All weights resident in VMEM.
    x = x_ref[...]

    h = jnp.maximum(
        jnp.dot(x, w1_ref[...], preferred_element_type=jnp.float32) + b1_ref[...], 0.0)
    h = jnp.maximum(
        jnp.dot(h, w2_ref[...], preferred_element_type=jnp.float32) + b2_ref[...], 0.0)
    h = jnp.maximum(
        jnp.dot(h, w3_ref[...], preferred_element_type=jnp.float32) + b3_ref[...], 0.0)

    # Final layer (out_features = 1) as an NT matmul: (1, H) x (tile, H)^T -> (1, tile).
    # Result is produced directly in a lane-dense layout => unmasked vector stores.
    y = lax.dot_general(w4t_ref[...], h,
                        dimension_numbers=(((1,), (1,)), ((), ())),
                        preferred_element_type=jnp.float32)
    o_ref[...] = (y + b4_ref[...]).astype(o_ref.dtype)


@functools.partial(jax.jit, static_argnames=("batch_tile",))
def mlp_forward(x, params, *, batch_tile=256):
    """x: (B, 45) float32. params: dict of (in, out) weights and (1, out) biases."""
    B, F = x.shape
    assert F == IN_DIM
    nodes = params["w1"].shape[1]

    # Tiling-friendly padded dims.
    in_p = _round_up(IN_DIM, 8)    # 45 -> 48
    hid_p = _round_up(nodes, 8)
    h3_p = _round_up(HID3, 8)      # 30 -> 32

    assert batch_tile % 128 == 0, "batch_tile must be a multiple of 128 (lane-dense output)"
    tile = min(batch_tile, _round_up(B, 128))
    b_pad = _round_up(B, tile)

    # Zero-pad operands (zeros contribute nothing; padded rows are sliced off).
    x_p = jnp.pad(x, ((0, b_pad - B), (0, in_p - F)))
    w1 = _pad2d(params["w1"], in_p, hid_p)
    b1 = _pad2d(params["b1"], 1, hid_p)
    w2 = _pad2d(params["w2"], hid_p, hid_p)
    b2 = _pad2d(params["b2"], 1, hid_p)
    w3 = _pad2d(params["w3"], hid_p, h3_p)
    b3 = _pad2d(params["b3"], 1, h3_p)
    w4t = _pad2d(params["w4"].T, 1, h3_p)   # final layer stored transposed: (1, 30) -> (1, 32)
    b4 = params["b4"]                       # (1, 1)

    grid = (b_pad // tile,)

    def x_map(i):
        return (i, 0)

    def full_map(i):
        return (0, 0)

    def out_map(i):
        return (0, i)

    out_row = pl.pallas_call(
        mlp_kernel,
        out_shape=jax.ShapeDtypeStruct((1, b_pad), jnp.float32),
        grid_spec=pltpu.PrefetchScalarGridSpec(
            num_scalar_prefetch=0,
            grid=grid,
            in_specs=[
                pl.BlockSpec((tile, in_p), x_map),
                pl.BlockSpec((in_p, hid_p), full_map),
                pl.BlockSpec((1, hid_p), full_map),
                pl.BlockSpec((hid_p, hid_p), full_map),
                pl.BlockSpec((1, hid_p), full_map),
                pl.BlockSpec((hid_p, h3_p), full_map),
                pl.BlockSpec((1, h3_p), full_map),
                pl.BlockSpec((1, h3_p), full_map),
                pl.BlockSpec((1, 1), full_map),
            ],
            out_specs=pl.BlockSpec((1, tile), out_map),
        ),
        compiler_params=pltpu.CompilerParams(
            dimension_semantics=("parallel",)),
    )(x_p, w1, b1, w2, b2, w3, b3, w4t, b4)

    # (1, b_pad) lane-dense slab -> (B, 1) column vector (pure reshape, no transpose).
    return out_row.reshape(b_pad, 1)[:B]


def init_params(key, nodes):
    """Deterministic PyTorch-style Linear init: U(-1/sqrt(fan_in), 1/sqrt(fan_in))."""
    def linear(k, fan_in, fan_out):
        kw, kb = jax.random.split(k)
        bound = 1.0 / jnp.sqrt(jnp.float32(fan_in))
        # stored as (in, out) so the kernel does x @ W
        w = jax.random.uniform(kw, (fan_in, fan_out), jnp.float32, -bound, bound)
        b = jax.random.uniform(kb, (1, fan_out), jnp.float32, -bound, bound)
        return w, b

    k1, k2, k3, k4 = jax.random.split(key, 4)
    w1, b1 = linear(k1, IN_DIM, nodes)
    w2, b2 = linear(k2, nodes, nodes)
    w3, b3 = linear(k3, nodes, HID3)
    w4, b4 = linear(k4, HID3, OUT_DIM)
    return {"w1": w1, "b1": b1, "w2": w2, "b2": b2,
            "w3": w3, "b3": b3, "w4": w4, "b4": b4}


def mlp_reference(x, p):
    h = jnp.maximum(x @ p["w1"] + p["b1"], 0.0)
    h = jnp.maximum(h @ p["w2"] + p["b2"], 0.0)
    h = jnp.maximum(h @ p["w3"] + p["b3"], 0.0)
    return h @ p["w4"] + p["b4"]


if __name__ == "__main__":
    key = jax.random.PRNGKey(0)
    nodes = 32
    batch = 512   # 2 grid steps of 256 -> both TensorCores busy on v7x

    kp, kx = jax.random.split(key)
    params = init_params(kp, nodes)
    x = jax.random.normal(kx, (batch, IN_DIM), jnp.float32)

    out = jax.block_until_ready(mlp_forward(x, params, batch_tile=256))

    ref = mlp_reference(x, params)
    assert out.shape == (batch, OUT_DIM)
    assert jnp.allclose(out, ref, atol=1e-4, rtol=1e-4), "mismatch vs reference"

    # Also exercise a batch that is not a multiple of the tile (padding path).
    x_small = jax.random.normal(kx, (37, IN_DIM), jnp.float32)
    out_small = jax.block_until_ready(mlp_forward(x_small, params))
    assert out_small.shape == (37, OUT_DIM)
    assert jnp.allclose(out_small, mlp_reference(x_small, params), atol=1e-4, rtol=1e-4)

    print("KERNEL_OK")
</pallas_src>

<mosaic_0001>
module attributes {stable_mosaic.version = 11 : i64} {
  func.func @mlp_kernel(%arg0: i32, %arg1: memref<256x48xf32, #tpu.memory_space<vmem>>, %arg2: memref<48x32xf32, #tpu.memory_space<vmem>>, %arg3: memref<1x32xf32, #tpu.memory_space<vmem>>, %arg4: memref<32x32xf32, #tpu.memory_space<vmem>>, %arg5: memref<1x32xf32, #tpu.memory_space<vmem>>, %arg6: memref<32x32xf32, #tpu.memory_space<vmem>>, %arg7: memref<1x32xf32, #tpu.memory_space<vmem>>, %arg8: memref<1x32xf32, #tpu.memory_space<vmem>>, %arg9: memref<1x1xf32, #tpu.memory_space<vmem>>, %arg10: memref<1x256xf32, #tpu.memory_space<vmem>>) attributes {dimension_semantics = [#tpu.dimension_semantics<parallel>], iteration_bounds = array<i64: 2>, scalar_prefetch = 0 : i64, scratch_operands = 0 : i64, tpu.core_type = #tpu.core_type<tc>, window_params = [{transform_indices = @transform_0, window_bounds = array<i64: 256, 48>}, {pipeline_mode = #tpu.pipeline_mode<synchronous>, transform_indices = @transform_1, window_bounds = array<i64: 48, 32>}, {pipeline_mode = #tpu.pipeline_mode<synchronous>, transform_indices = @transform_2, window_bounds = array<i64: 1, 32>}, {pipeline_mode = #tpu.pipeline_mode<synchronous>, transform_indices = @transform_3, window_bounds = array<i64: 32, 32>}, {pipeline_mode = #tpu.pipeline_mode<synchronous>, transform_indices = @transform_4, window_bounds = array<i64: 1, 32>}, {pipeline_mode = #tpu.pipeline_mode<synchronous>, transform_indices = @transform_5, window_bounds = array<i64: 32, 32>}, {pipeline_mode = #tpu.pipeline_mode<synchronous>, transform_indices = @transform_6, window_bounds = array<i64: 1, 32>}, {pipeline_mode = #tpu.pipeline_mode<synchronous>, transform_indices = @transform_7, window_bounds = array<i64: 1, 32>}, {pipeline_mode = #tpu.pipeline_mode<synchronous>, transform_indices = @transform_8, window_bounds = array<i64: 1, 1>}, {transform_indices = @transform_9, window_bounds = array<i64: 1, 256>}]} {
    %c0 = arith.constant 0 : index
    %c0_0 = arith.constant 0 : index
    %0 = vector.load %arg1[%c0, %c0_0] : memref<256x48xf32, #tpu.memory_space<vmem>>, vector<256x48xf32>
    %c0_1 = arith.constant 0 : index
    %c0_2 = arith.constant 0 : index
    %1 = vector.load %arg2[%c0_1, %c0_2] : memref<48x32xf32, #tpu.memory_space<vmem>>, vector<48x32xf32>
    %cst = arith.constant dense<0.000000e+00> : vector<256x32xf32>
    %2 = tpu.matmul %0, %1, %cst {dimension_numbers = #tpu.dot_dimension_numbers<[1], [0], [0], [1], [0, 0, 1, 1], [], []>} : vector<256x48xf32>, vector<48x32xf32>, vector<256x32xf32> -> vector<256x32xf32>
    %c0_3 = arith.constant 0 : index
    %c0_4 = arith.constant 0 : index
    %3 = vector.load %arg3[%c0_3, %c0_4] : memref<1x32xf32, #tpu.memory_space<vmem>>, vector<1x32xf32>
    %4 = vector.broadcast %3 : vector<1x32xf32> to vector<256x32xf32>
    %5 = arith.addf %2, %4 : vector<256x32xf32>
    %cst_5 = arith.constant 0.000000e+00 : f32
    %6 = vector.broadcast %cst_5 : f32 to vector<256x32xf32>
    %7 = arith.maximumf %5, %6 : vector<256x32xf32>
    %c0_6 = arith.constant 0 : index
    %c0_7 = arith.constant 0 : index
    %8 = vector.load %arg4[%c0_6, %c0_7] : memref<32x32xf32, #tpu.memory_space<vmem>>, vector<32x32xf32>
    %cst_8 = arith.constant dense<0.000000e+00> : vector<256x32xf32>
    %9 = tpu.matmul %7, %8, %cst_8 {dimension_numbers = #tpu.dot_dimension_numbers<[1], [0], [0], [1], [0, 0, 1, 1], [], []>} : vector<256x32xf32>, vector<32x32xf32>, vector<256x32xf32> -> vector<256x32xf32>
    %c0_9 = arith.constant 0 : index
    %c0_10 = arith.constant 0 : index
    %10 = vector.load %arg5[%c0_9, %c0_10] : memref<1x32xf32, #tpu.memory_space<vmem>>, vector<1x32xf32>
    %11 = vector.broadcast %10 : vector<1x32xf32> to vector<256x32xf32>
    %12 = arith.addf %9, %11 : vector<256x32xf32>
    %cst_11 = arith.constant 0.000000e+00 : f32
    %13 = vector.broadcast %cst_11 : f32 to vector<256x32xf32>
    %14 = arith.maximumf %12, %13 : vector<256x32xf32>
    %c0_12 = arith.constant 0 : index
    %c0_13 = arith.constant 0 : index
    %15 = vector.load %arg6[%c0_12, %c0_13] : memref<32x32xf32, #tpu.memory_space<vmem>>, vector<32x32xf32>
    %cst_14 = arith.constant dense<0.000000e+00> : vector<256x32xf32>
    %16 = tpu.matmul %14, %15, %cst_14 {dimension_numbers = #tpu.dot_dimension_numbers<[1], [0], [0], [1], [0, 0, 1, 1], [], []>} : vector<256x32xf32>, vector<32x32xf32>, vector<256x32xf32> -> vector<256x32xf32>
    %c0_15 = arith.constant 0 : index
    %c0_16 = arith.constant 0 : index
    %17 = vector.load %arg7[%c0_15, %c0_16] : memref<1x32xf32, #tpu.memory_space<vmem>>, vector<1x32xf32>
    %18 = vector.broadcast %17 : vector<1x32xf32> to vector<256x32xf32>
    %19 = arith.addf %16, %18 : vector<256x32xf32>
    %cst_17 = arith.constant 0.000000e+00 : f32
    %20 = vector.broadcast %cst_17 : f32 to vector<256x32xf32>
    %21 = arith.maximumf %19, %20 : vector<256x32xf32>
    %c0_18 = arith.constant 0 : index
    %c0_19 = arith.constant 0 : index
    %22 = vector.load %arg8[%c0_18, %c0_19] : memref<1x32xf32, #tpu.memory_space<vmem>>, vector<1x32xf32>
    %cst_20 = arith.constant dense<0.000000e+00> : vector<1x256xf32>
    %23 = tpu.matmul %22, %21, %cst_20 {dimension_numbers = #tpu.dot_dimension_numbers<[1], [1], [0], [0], [0, 0, 1, 0], [], []>} : vector<1x32xf32>, vector<256x32xf32>, vector<1x256xf32> -> vector<1x256xf32>
    %c0_21 = arith.constant 0 : index
    %c0_22 = arith.constant 0 : index
    %24 = vector.load %arg9[%c0_21, %c0_22] : memref<1x1xf32, #tpu.memory_space<vmem>>, vector<1x1xf32>
    %25 = vector.broadcast %24 : vector<1x1xf32> to vector<1x256xf32>
    %26 = arith.addf %23, %25 : vector<1x256xf32>
    %c0_23 = arith.constant 0 : index
    %c0_24 = arith.constant 0 : index
    %27 = vector.load %arg10[%c0_23, %c0_24] : memref<1x256xf32, #tpu.memory_space<vmem>>, vector<1x256xf32>
    tpu.vector_store %arg10[%c0_23, %c0_24], %26 {strides = array<i32>} : memref<1x256xf32, #tpu.memory_space<vmem>>, vector<1x256xf32>,
    return
  }
  func.func @transform_0(%arg0: i32) -> (i32, i32) {
    %c0_i32 = arith.constant 0 : i32
    %c0_i32_0 = arith.constant 0 : i32
    return %arg0, %c0_i32 : i32, i32
  }
  func.func @transform_1(%arg0: i32) -> (i32, i32) {
    %c0_i32 = arith.constant 0 : i32
    %c0_i32_0 = arith.constant 0 : i32
    %c0_i32_1 = arith.constant 0 : i32
    return %c0_i32, %c0_i32_0 : i32, i32
  }
  func.func @transform_2(%arg0: i32) -> (i32, i32) {
    %c0_i32 = arith.constant 0 : i32
    %c0_i32_0 = arith.constant 0 : i32
    %c0_i32_1 = arith.constant 0 : i32
    return %c0_i32, %c0_i32_0 : i32, i32
  }
  func.func @transform_3(%arg0: i32) -> (i32, i32) {
    %c0_i32 = arith.constant 0 : i32
    %c0_i32_0 = arith.constant 0 : i32
    %c0_i32_1 = arith.constant 0 : i32
    return %c0_i32, %c0_i32_0 : i32, i32
  }
  func.func @transform_4(%arg0: i32) -> (i32, i32) {
    %c0_i32 = arith.constant 0 : i32
    %c0_i32_0 = arith.constant 0 : i32
    %c0_i32_1 = arith.constant 0 : i32
    return %c0_i32, %c0_i32_0 : i32, i32
  }
  func.func @transform_5(%arg0: i32) -> (i32, i32) {
    %c0_i32 = arith.constant 0 : i32
    %c0_i32_0 = arith.constant 0 : i32
    %c0_i32_1 = arith.constant 0 : i32
    return %c0_i32, %c0_i32_0 : i32, i32
  }
  func.func @transform_6(%arg0: i32) -> (i32, i32) {
    %c0_i32 = arith.constant 0 : i32
    %c0_i32_0 = arith.constant 0 : i32
    %c0_i32_1 = arith.constant 0 : i32
    return %c0_i32, %c0_i32_0 : i32, i32
  }
  func.func @transform_7(%arg0: i32) -> (i32, i32) {
    %c0_i32 = arith.constant 0 : i32
    %c0_i32_0 = arith.constant 0 : i32
    %c0_i32_1 = arith.constant 0 : i32
    return %c0_i32, %c0_i32_0 : i32, i32
  }
  func.func @transform_8(%arg0: i32) -> (i32, i32) {
    %c0_i32 = arith.constant 0 : i32
    %c0_i32_0 = arith.constant 0 : i32
    %c0_i32_1 = arith.constant 0 : i32
    return %c0_i32, %c0_i32_0 : i32, i32
  }
  func.func @transform_9(%arg0: i32) -> (i32, i32) {
    %c0_i32 = arith.constant 0 : i32
    %c0_i32_0 = arith.constant 0 : i32
    return %c0_i32, %arg0 : i32, i32
  }
}

</mosaic_0001>

<bundles_post_ra>
// kernel: mlp_forward.1
= control target key start
LH: loop header
LB: loop body
LE: loop exit
PB: predicated region body
PF: predicated region fallthrough
CT: control target
= control target key end

     0   :  { %s2894_s0 = inlined_call_operand.vmem [shape: f32[512,48], index: 0, kind: input, shape index: {}]   ;;  %s2895_s1 = inlined_call_operand.vmem [shape: f32[48,32], index: 1, kind: input, shape index: {}]   ;;  %s2896_s2 = inlined_call_operand.vmem [shape: f32[1,32], index: 2, kind: input, shape index: {}]   ;;  %s2897_s3 = inlined_call_operand.vmem [shape: f32[32,32], index: 3, kind: input, shape index: {}]   ;;  %s2898_s4 = inlined_call_operand.vmem [shape: f32[1,32], index: 4, kind: input, shape index: {}]   ;;  %s2899_s5 = inlined_call_operand.vmem [shape: f32[32,32], index: 5, kind: input, shape index: {}]   ;;  %s2900_s6 = inlined_call_operand.vmem [shape: f32[1,32], index: 6, kind: input, shape index: {}]   ;;  %s2901_s7 = inlined_call_operand.vmem [shape: f32[1,32], index: 7, kind: input, shape index: {}]   ;;  %s2902_s8 = inlined_call_operand.<no memory space> [shape: f32[1,1], index: 8, kind: input, shape index: {}]   ;;  %s2903_s9 = inlined_call_operand.hbm [shape: f32[1,512], index: 9, kind: output, shape index: {}]  }
   0x1   :  { %v14_v0 = vstv %s2902_s8 }
   0x2   :  { %15 = vst [vmem:[#allocation2] sm:$0x1] %v14_v0 }
   0x3   :  { %16 = vsyncpa [#allocation4], 0 }
   0x4   :  { %18 = vsyncpa [#allocation4 + $0x1], 0  ;;  %s2441_s11 = smov 0   ;;  %s2443_s12 = smov 0  }
   0x5   :  { %s2445_s13 = smov 0   ;;  %s2447_s14 = smov 0  }
   0x6 LB: > { %s1741_s8 = sadd.s32 4294967295, %s2383_s14   ;;  %s1742_s15 = sadd.s32 4294967294, %s2383_s14   ;;  %s2383_s14 = sphi %s2447_s14, %s2911_s14   ;;  %s2379_s13 = sphi %s2445_s13, %s2910_s13   ;;  %s2375_s12 = sphi %s2443_s12, %s2909_s12   ;;  %s2371_s11 = sphi %s2441_s11, %s2908_s11  }
   0x7   : > { %s2464_s16 = sadd.s32 1, %s2383_s14   ;;  %s225_s17 = sadd.s32 1, %s2379_s13 }
   0x8   : > { %s222_s18 = ssub.s32 %s2383_s14, %s2464_s16  ;;  %p235_p0 = scmp.ne.s32.totalorder %s2379_s13, %s2375_s12 }
   0x9   : > { %p223_p1 = scmp.eq.s32.totalorder %s222_s18, 0  ;;  %p236_p2 = scmp.eq.s32.totalorder %s1741_s8, 1 }
   0xa   : > { %p241_p3 = scmp.ne.s32.totalorder %s2375_s12, %s2371_s11  ;;  %p242_p4 = scmp.eq.s32.totalorder %s1742_s15, 1 }
   0xb   : > { %s2474_s19 = scalar_select %p223_p1, %s2379_s13, %s225_s17  }
   0xc   : > { %p2476_p5 = por %p236_p2, %p235_p0  ;;  %p2480_p6 = por %p242_p4, %p241_p3 }
   0xd   : > { %p1745_p7 = scmp.ge.s32.totalorder %s2383_s14, 1  ;;  %p293_p8 = scmp.lt.s32.totalorder %s2383_s14, 3 }
   0xf   : > { %p294_p9 = pnand %p1745_p7, %p293_p8 }
  0x10   : > { %v368_v1 = vld [vmem:[%s2895_s1] sm:$0xff] (!%p294_p9)  ;;  %v369_v2 = vld [vmem:[%s2895_s1 + $0x8] sm:$0xff] (!%p294_p9)  ;;  %v370_v3 = vld [vmem:[%s2895_s1 + $0x10] sm:$0xff] (!%p294_p9)  ;;  %s2495_s28 = sshll.u32 (!%p294_p9), %s1741_s8, 5  ;;  %vm381_vm0 = vcmask (!%p294_p9), 392192   ;;  %vm746_vm1 = vcmask (!%p294_p9), 261120  }
  0x11   : > { %297 = sbr.rel (%p294_p9) target bundleno = 1017 (0x3f9), region = 56  ;;  %v2203_v4 = vpack.c.bf16 (!%p294_p9), %v369_v2, %v368_v1  ;;  %v371_v5 = vld [vmem:[%s2895_s1 + $0x18] sm:$0xff] (!%p294_p9)  ;;  %v372_v6 = vld [vmem:[%s2895_s1 + $0x20] sm:$0xff] (!%p294_p9)  ;;  %p330_p10 = scmp.lt.s32.totalorder (!%p294_p9), %s2495_s28, 63  ;;  %v373_v8 = vld [vmem:[%s2895_s1 + $0x28] sm:$0xff] (!%p294_p9) }
  0x12   : > { %v2207_v7 = vpack.c.bf16 (!%p294_p9), %v371_v5, %v370_v3  ;;  %v735_v9 = vld [vmem:[%s2897_s3] sm:$0xff] (!%p294_p9)  ;;  %v736_v10 = vld [vmem:[%s2897_s3 + $0x8] sm:$0xff] (!%p294_p9)  ;;  %v2211_v12 = vpack.c.bf16 (!%p294_p9), %v373_v8, %v372_v6  ;;  %v737_v45 = vld [vmem:[%s2897_s3 + $0x10] sm:$0xff] (!%p294_p9)  ;;  %s326_s24 = sand.u32 (!%p294_p9), 1, %s2375_s12   ;;  %s2852_s10 = scalar_lea.hbm (!%p294_p9), %s2903_s9, %s2495_s28 }
  0x13   : > { %2204 = vmatprep.subr.bf16.mxu0 (!%p294_p9), %v2203_v4  ;;  %v2215_v11 = vpack.c.bf16 (!%p294_p9), %v736_v10, %v735_v9  ;;  %v738_v46 = vld [vmem:[%s2897_s3 + $0x18] sm:$0xff] (!%p294_p9)  ;;  %v1100_v48 = vld [vmem:[%s2899_s5] sm:$0xff] (!%p294_p9)  ;;  %v1101_v49 = vld [vmem:[%s2899_s5 + $0x8] sm:$0xff] (!%p294_p9)  ;;  %s1669_s15 = scalar_lea.sflag (!%p294_p9), [#allocation4], %s326_s24  ;;  %s2387_s18 = smov (!%p294_p9), [#allocation3]  }
  0x14   : > { %2206 = vmatpush3.bf16.msra.mxu0 (!%p294_p9), %v2203_v4  ;;  %v2219_v47 = vpack.c.bf16 (!%p294_p9), %v738_v46, %v737_v45  ;;  %v2223_v50 = vpack.c.bf16 (!%p294_p9), %v1101_v49, %v1100_v48  ;;  %v2598_v51 = vld [vmem:[%s2896_s2] ss:$0 sm:$0xff] (!%p294_p9)  ;;  %v1102_v56 = vld [vmem:[%s2899_s5 + $0x10] sm:$0xff] (!%p294_p9)  ;;  %v1103_v57 = vld [vmem:[%s2899_s5 + $0x18] sm:$0xff] (!%p294_p9)  ;;  %s2325_s22 = sshll.u32 (!%p294_p9), %s2387_s18, 4  ;;  %s2326_s22 = int_to_ptr.vmem [resolvable:$false] %s2325_s22 }
  0x15   : > { %2208 = vmatprep.subr.bf16.mxu0 (!%p294_p9), %v2207_v7  ;;  %2216 = vmatprep.subr.bf16.mxu1 (!%p294_p9), %v2215_v11  ;;  %v2227_v63 = vpack.c.bf16 (!%p294_p9), %v1103_v57, %v1102_v56  ;;  %vm2788_vm2 = vmpackc.low (!%p294_p9), %vm746_vm1, %vm746_vm1  ;;  %s2327_s8 = scalar_lea.vmem (!%p294_p9), %s2326_s22, 64 }
  0x16   : > { %2218 = vmatpush3.bf16.msra.mxu1 (!%p294_p9), %v2215_v11 }
  0x17   : > { %2220 = vmatprep.subr.bf16.mxu1 (!%p294_p9), %v2219_v47 }
  0x18   : > { %s331_s25 = scalar_select %p330_p10, %s2495_s28, 63  ;;  %2210 = vmatpush3.bf16.msra.mxu0 %v2207_v7 }
  0x19   : > { %2212 = vmatprep.subr.bf16.mxu0 %v2211_v12 }
  0x1a   : > { %s1748_s26 = sshll.u32 %s331_s25, 3  ;;  %2222 = vmatpush3.bf16.msra.mxu1 %v2219_v47  ;;  %s1746_s25 = sshll.u32 %s326_s24, 1 }
  0x1b   : > { %s2517_s30 = scalar_lea.vmem %s2894_s0, %s1748_s26  ;;  %2224 = vmatprep.subr.bf16.mxu1 %v2223_v50  ;;  %s328_s26 = scalar_lea.vmem [#allocation3], %s1746_s25 }
  0x1c   : > { %v336_v13 = vld [vmem:[%s2517_s30] sm:$0xff]  ;;  %2214 = vmatpush3.bf16.msra.mxu0 %v2211_v12  ;;  %v337_v14 = vld [vmem:[%s2517_s30 + $0x8] sm:$0xff]  ;;  %v338_v15 = vld [vmem:[%s2517_s30 + $0x10] sm:$0xff]  ;;  %s1683_s27 = sshll.u32 %s328_s26, 4  ;;  %s2854_s27 = int_to_ptr.vmem [resolvable:$true] %s1683_s27 }
  0x1d   : > { %2043 = vmatprep.mubr.msk.f32.mxu0 %vm381_vm0, %v336_v13  ;;  %v339_v16 = vld [vmem:[%s2517_s30 + $0x18] sm:$0xff]  ;;  %v340_v17 = vld [vmem:[%s2517_s30 + $0x20] sm:$0xff]  ;;  %v341_v18 = vld [vmem:[%s2517_s30 + $0x28] sm:$0xff]  ;;  %s2321_s17 = scalar_lea.vmem %s2854_s27, 32  ;;  %p2328_p0 = scmp.lt.s32.totalorder %s2854_s27, %s2326_s22 }
  0x1e   : > { %v342_v19 = vld [vmem:[%s2517_s30 + $0x30] sm:$0xff]  ;;  %v343_v20 = vld [vmem:[%s2517_s30 + $0x38] sm:$0xff]  ;;  %v344_v21 = vld [vmem:[%s2517_s30 + $0x40] sm:$0xff]  ;;  %p2322_p11 = scmp.ne.s32.totalorder %s2854_s27, %s2321_s17  ;;  %p2329_p1 = scmp.lt.s32.totalorder %s2327_s8, %s2321_s17 }
  0x1f   : > { %2044 = vmatmul.mubr.msk.f32.vlgmr.msra.gmra.mrb[0].mxu0 %vm381_vm0, %v337_v14  ;;  %v345_v22 = vld [vmem:[%s2517_s30 + $0x48] sm:$0xff]  ;;  %v346_v23 = vld [vmem:[%s2517_s30 + $0x50] sm:$0xff]  ;;  %v347_v24 = vld [vmem:[%s2517_s30 + $0x58] sm:$0xff] }
  0x20   : > { %2046 = vmatprep.mubr.msk.f32.mxu0 %vm381_vm0, %v338_v15  ;;  %v348_v25 = vld [vmem:[%s2517_s30 + $0x60] sm:$0xff]  ;;  %v349_v26 = vld [vmem:[%s2517_s30 + $0x68] sm:$0xff]  ;;  %v350_v27 = vld [vmem:[%s2517_s30 + $0x70] sm:$0xff]  ;;  %p2323_p12 = pnand %p2322_p11, %p2476_p5  ;;  %p2330_p2 = por %p2329_p1, %p2328_p0 }
  0x21   : > { %v351_v28 = vld [vmem:[%s2517_s30 + $0x78] sm:$0xff]  ;;  %v352_v29 = vld [vmem:[%s2517_s30 + $0x80] sm:$0xff]  ;;  %v353_v30 = vld [vmem:[%s2517_s30 + $0x88] sm:$0xff] }
  0x22   : > { %v354_v31 = vld [vmem:[%s2517_s30 + $0x90] sm:$0xff]  ;;  %v355_v32 = vld [vmem:[%s2517_s30 + $0x98] sm:$0xff]  ;;  %v356_v33 = vld [vmem:[%s2517_s30 + $0xa0] sm:$0xff]  ;;  %p2324_p13 = pneg %p2323_p12 }
  0x23   : > { %2047 = vmatmul.mubr.msk.f32.gmra.mrb[2].mxu0 %vm381_vm0, %v339_v16  ;;  %v357_v34 = vld [vmem:[%s2517_s30 + $0xa8] sm:$0xff]  ;;  %v358_v35 = vld [vmem:[%s2517_s30 + $0xb0] sm:$0xff]  ;;  %v359_v36 = vld [vmem:[%s2517_s30 + $0xb8] sm:$0xff] }
  0x24   : > { %2049 = vmatprep.mubr.msk.f32.mxu0 %vm381_vm0, %v340_v17  ;;  %v360_v37 = vld [vmem:[%s2517_s30 + $0xc0] sm:$0xff]  ;;  %v361_v38 = vld [vmem:[%s2517_s30 + $0xc8] sm:$0xff]  ;;  %v362_v39 = vld [vmem:[%s2517_s30 + $0xd0] sm:$0xff]  ;;  %p2331_p3 = pnand %p2330_p2, %p2324_p13 }
  0x25   : > { %v363_v40 = vld [vmem:[%s2517_s30 + $0xd8] sm:$0xff]  ;;  %v364_v41 = vld [vmem:[%s2517_s30 + $0xe0] sm:$0xff]  ;;  %v365_v42 = vld [vmem:[%s2517_s30 + $0xe8] sm:$0xff] }
  0x26   : > { %v366_v43 = vld [vmem:[%s2517_s30 + $0xf0] sm:$0xff]  ;;  %v367_v44 = vld [vmem:[%s2517_s30 + $0xf8] sm:$0xff] }
  0x27   : > { %2050 = vmatmul.mubr.msk.f32.gmra.mrb[4].mxu0 %vm381_vm0, %v341_v18 }
  0x28   : > { %2052 = vmatprep.mubr.msk.f32.mxu0 %vm381_vm0, %v342_v19 }
  0x2b   : > { %2053 = vmatmul.mubr.msk.f32.gmra.mrb[6].mxu0 %vm381_vm0, %v343_v20 }
  0x2c   : > { %2055 = vmatprep.mubr.msk.f32.mxu0 %vm381_vm0, %v344_v21 }
  0x2f   : > { %2056 = vmatmul.mubr.msk.f32.gmra.mrb[8].mxu0 %vm381_vm0, %v345_v22 }
  0x30   : > { %2058 = vmatprep.mubr.msk.f32.mxu0 %vm381_vm0, %v346_v23 }
  0x33   : > { %2059 = vmatmul.mubr.msk.f32.gmra.mrb[10].mxu0 %vm381_vm0, %v347_v24 }
  0x34   : > { %2061 = vmatprep.mubr.msk.f32.mxu0 %vm381_vm0, %v348_v25 }
  0x37   : > { %2062 = vmatmul.mubr.msk.f32.gmra.mrb[12].mxu0 %vm381_vm0, %v349_v26 }
  0x38   : > { %2064 = vmatprep.mubr.msk.f32.mxu0 %vm381_vm0, %v350_v27 }
  0x3b   : > { %2065 = vmatmul.mubr.msk.f32.gmra.mrb[14].mxu0 %vm381_vm0, %v351_v28 }
  0x3c   : > { %2067 = vmatprep.mubr.msk.f32.mxu0 %vm381_vm0, %v352_v29 }
  0x3f   : > { %2068 = vmatmul.mubr.msk.f32.gmra.mrb[16].mxu0 %vm381_vm0, %v353_v30 }
  0x40   : > { %2070 = vmatprep.mubr.msk.f32.mxu0 %vm381_vm0, %v354_v31 }
  0x43   : > { %2071 = vmatmul.mubr.msk.f32.gmra.mrb[18].mxu0 %vm381_vm0, %v355_v32 }
  0x44   : > { %2073 = vmatprep.mubr.msk.f32.mxu0 %vm381_vm0, %v356_v33 }
  0x47   : > { %2074 = vmatmul.mubr.msk.f32.gmra.mrb[20].mxu0 %vm381_vm0, %v357_v34 }
  0x48   : > { %2076 = vmatprep.mubr.msk.f32.mxu0 %vm381_vm0, %v358_v35 }
  0x4b   : > { %2077 = vmatmul.mubr.msk.f32.gmra.mrb[22].mxu0 %vm381_vm0, %v359_v36 }
  0x4c   : > { %2079 = vmatprep.mubr.msk.f32.mxu0 %vm381_vm0, %v360_v37 }
  0x4f   : > { %2080 = vmatmul.mubr.msk.f32.gmra.mrb[24].mxu0 %vm381_vm0, %v361_v38 }
  0x50   : > { %2082 = vmatprep.mubr.msk.f32.mxu0 %vm381_vm0, %v362_v39 }
  0x53   : > { %2083 = vmatmul.mubr.msk.f32.gmra.mrb[26].mxu0 %vm381_vm0, %v363_v40 }
  0x54   : > { %2085 = vmatprep.mubr.msk.f32.mxu0 %vm381_vm0, %v364_v41 }
  0x57   : > { %2086 = vmatmul.mubr.msk.f32.gmra.mrb[28].mxu0 %vm381_vm0, %v365_v42 }
  0x58   : > { %2088 = vmatprep.mubr.msk.f32.mxu0 %vm381_vm0, %v366_v43 }
  0x5b   : > { %2089 = vmatmul.mubr.msk.f32.gmra.mrb[30].mxu0 %vm381_vm0, %v367_v44 }
  0xf2   : > { %v2045_v52 = vpop.f32.mrb[0].mxu0 }
  0xf3   : > { %v550_v53 = vadd.f32 %v2045_v52, %v2598_v51  ;;  %v544_v54 = vpop.f32.mrb[1].mxu0 }
  0xf4   : > { %v545_v55 = vadd.f32 %v2598_v51, %v544_v54 }
  0xf5   : > { %v704_v60 = vmax.f32 %v550_v53, 0.0 }
  0xf6   : > { %v703_v58 = vmax.f32 %v545_v55, 0.0  ;;  %v2048_v59 = vpop.f32.mrb[2].mxu0 }
  0xf7   : > { %v560_v61 = vadd.f32 %v2048_v59, %v2598_v51  ;;  %v554_v62 = vpop.f32.mrb[3].mxu0 }
  0xf8   : > { %v555_v0 = vadd.f32 %v2598_v51, %v554_v62  ;;  %2099 = vmatprep.mubr.msk.f32.mxu1 %vm746_vm1, %v703_v58 }
  0xf9   : > { %2100 = vmatmul.mubr.msk.f32.vlgmr.msra.gmra.mrb[0].mxu1 %vm746_vm1, %v704_v60  ;;  %v706_v3 = vmax.f32 %v560_v61, 0.0 }
  0xfa   : > { %v705_v1 = vmax.f32 %v555_v0, 0.0  ;;  %v2051_v2 = vpop.f32.mrb[4].mxu0  ;;  %2226 = vmatpush3.bf16.msra.mxu1 %v2223_v50 }
  0xfb   : > { %v570_v4 = vadd.f32 %v2051_v2, %v2598_v51  ;;  %v564_v5 = vpop.f32.mrb[5].mxu0  ;;  %2228 = vmatprep.subr.bf16.mxu1 %v2227_v63 }
  0xfc   : > { %v565_v6 = vadd.f32 %v2598_v51, %v564_v5  ;;  %2102 = vmatprep.mubr.msk.f32.mxu1 %vm746_vm1, %v705_v1 }
  0xfd   : > { %2103 = vmatmul.mubr.msk.f32.gmra.mrb[2].mxu1 %vm746_vm1, %v706_v3  ;;  %v708_v9 = vmax.f32 %v570_v4, 0.0 }
  0xfe   : > { %v707_v7 = vmax.f32 %v565_v6, 0.0  ;;  %v2054_v8 = vpop.f32.mrb[6].mxu0  ;;  %2230 = vmatpush3.bf16.msra.mxu1 %v2227_v63 }
  0xff   : > { %v580_v10 = vadd.f32 %v2054_v8, %v2598_v51  ;;  %v574_v11 = vpop.f32.mrb[7].mxu0 }
 0x100   : > { %v575_v12 = vadd.f32 %v2598_v51, %v574_v11  ;;  %2105 = vmatprep.mubr.msk.f32.mxu1 %vm746_vm1, %v707_v7 }
 0x101   : > { %2106 = vmatmul.mubr.msk.f32.gmra.mrb[4].mxu1 %vm746_vm1, %v708_v9  ;;  %v710_v15 = vmax.f32 %v580_v10, 0.0 }
 0x102   : > { %v709_v13 = vmax.f32 %v575_v12, 0.0  ;;  %v2057_v14 = vpop.f32.mrb[8].mxu0 }
 0x103   : > { %v590_v16 = vadd.f32 %v2057_v14, %v2598_v51  ;;  %v584_v17 = vpop.f32.mrb[9].mxu0 }
 0x104   : > { %v585_v18 = vadd.f32 %v2598_v51, %v584_v17  ;;  %2108 = vmatprep.mubr.msk.f32.mxu1 %vm746_vm1, %v709_v13 }
 0x105   : > { %2109 = vmatmul.mubr.msk.f32.gmra.mrb[6].mxu1 %vm746_vm1, %v710_v15  ;;  %v712_v21 = vmax.f32 %v590_v16, 0.0 }
 0x106   : > { %v711_v19 = vmax.f32 %v585_v18, 0.0  ;;  %v2060_v20 = vpop.f32.mrb[10].mxu0 }
 0x107   : > { %v600_v22 = vadd.f32 %v2060_v20, %v2598_v51  ;;  %v594_v23 = vpop.f32.mrb[11].mxu0 }
 0x108   : > { %v595_v24 = vadd.f32 %v2598_v51, %v594_v23  ;;  %2111 = vmatprep.mubr.msk.f32.mxu1 %vm746_vm1, %v711_v19 }
 0x109   : > { %2112 = vmatmul.mubr.msk.f32.gmra.mrb[8].mxu1 %vm746_vm1, %v712_v21  ;;  %v714_v27 = vmax.f32 %v600_v22, 0.0 }
 0x10a   : > { %v713_v25 = vmax.f32 %v595_v24, 0.0  ;;  %v2063_v26 = vpop.f32.mrb[12].mxu0  ;;  %v2673_v24 = vld [vmem:[%s2898_s4] ss:$0 sm:$0xff] }
 0x10b   : > { %v610_v28 = vadd.f32 %v2063_v26, %v2598_v51  ;;  %v604_v29 = vpop.f32.mrb[13].mxu0 }
 0x10c   : > { %v605_v30 = vadd.f32 %v2598_v51, %v604_v29  ;;  %2114 = vmatprep.mubr.msk.f32.mxu1 %vm746_vm1, %v713_v25 }
 0x10d   : > { %2115 = vmatmul.mubr.msk.f32.gmra.mrb[10].mxu1 %vm746_vm1, %v714_v27  ;;  %v716_v33 = vmax.f32 %v610_v28, 0.0 }
 0x10e   : > { %v715_v31 = vmax.f32 %v605_v30, 0.0  ;;  %v2066_v32 = vpop.f32.mrb[14].mxu0 }
 0x10f   : > { %v620_v34 = vadd.f32 %v2066_v32, %v2598_v51  ;;  %v614_v35 = vpop.f32.mrb[15].mxu0 }
 0x110   : > { %v615_v36 = vadd.f32 %v2598_v51, %v614_v35  ;;  %2117 = vmatprep.mubr.msk.f32.mxu1 %vm746_vm1, %v715_v31 }
 0x111   : > { %2118 = vmatmul.mubr.msk.f32.gmra.mrb[12].mxu1 %vm746_vm1, %v716_v33  ;;  %v718_v39 = vmax.f32 %v620_v34, 0.0 }
 0x112   : > { %v717_v37 = vmax.f32 %v615_v36, 0.0  ;;  %v2069_v38 = vpop.f32.mrb[16].mxu0 }
 0x113   : > { %v630_v40 = vadd.f32 %v2069_v38, %v2598_v51  ;;  %v624_v41 = vpop.f32.mrb[17].mxu0 }
 0x114   : > { %v625_v42 = vadd.f32 %v2598_v51, %v624_v41  ;;  %2120 = vmatprep.mubr.msk.f32.mxu1 %vm746_vm1, %v717_v37 }
 0x115   : > { %2121 = vmatmul.mubr.msk.f32.gmra.mrb[14].mxu1 %vm746_vm1, %v718_v39  ;;  %v720_v45 = vmax.f32 %v630_v40, 0.0 }
 0x116   : > { %v719_v43 = vmax.f32 %v625_v42, 0.0  ;;  %v2072_v44 = vpop.f32.mrb[18].mxu0 }
 0x117   : > { %v640_v46 = vadd.f32 %v2072_v44, %v2598_v51  ;;  %v634_v47 = vpop.f32.mrb[19].mxu0 }
 0x118   : > { %v635_v48 = vadd.f32 %v2598_v51, %v634_v47  ;;  %2123 = vmatprep.mubr.msk.f32.mxu1 %vm746_vm1, %v719_v43 }
 0x119   : > { %v722_v49 = vmax.f32 %v640_v46, 0.0  ;;  %2124 = vmatmul.mubr.msk.f32.gmra.mrb[16].mxu1 %vm746_vm1, %v720_v45 }
 0x11a   : > { %v721_v50 = vmax.f32 %v635_v48, 0.0  ;;  %v2075_v52 = vpop.f32.mrb[20].mxu0 }
 0x11b   : > { %v650_v53 = vadd.f32 %v2075_v52, %v2598_v51  ;;  %v644_v54 = vpop.f32.mrb[21].mxu0 }
 0x11c   : > { %2126 = vmatprep.mubr.msk.f32.mxu1 %vm746_vm1, %v721_v50  ;;  %v645_v55 = vadd.f32 %v2598_v51, %v644_v54 }
 0x11d   : > { %v724_v56 = vmax.f32 %v650_v53, 0.0  ;;  %2127 = vmatmul.mubr.msk.f32.gmra.mrb[18].mxu1 %vm746_vm1, %v722_v49 }
 0x11e   : > { %v723_v57 = vmax.f32 %v645_v55, 0.0  ;;  %v2078_v58 = vpop.f32.mrb[22].mxu0 }
 0x11f   : > { %v660_v59 = vadd.f32 %v2078_v58, %v2598_v51  ;;  %v654_v60 = vpop.f32.mrb[23].mxu0 }
 0x120   : > { %2129 = vmatprep.mubr.msk.f32.mxu1 %vm746_vm1, %v723_v57  ;;  %v655_v61 = vadd.f32 %v2598_v51, %v654_v60 }
 0x121   : > { %2130 = vmatmul.mubr.msk.f32.gmra.mrb[20].mxu1 %vm746_vm1, %v724_v56  ;;  %v726_v62 = vmax.f32 %v660_v59, 0.0 }
 0x122   : > { %v725_v63 = vmax.f32 %v655_v61, 0.0  ;;  %v2081_v0 = vpop.f32.mrb[24].mxu0 }
 0x123   : > { %v670_v1 = vadd.f32 %v2081_v0, %v2598_v51  ;;  %v664_v2 = vpop.f32.mrb[25].mxu0 }
 0x124   : > { %2132 = vmatprep.mubr.msk.f32.mxu1 %vm746_vm1, %v725_v63  ;;  %v665_v3 = vadd.f32 %v2598_v51, %v664_v2 }
 0x125   : > { %2133 = vmatmul.mubr.msk.f32.gmra.mrb[22].mxu1 %vm746_vm1, %v726_v62  ;;  %v728_v4 = vmax.f32 %v670_v1, 0.0 }
 0x126   : > { %v727_v5 = vmax.f32 %v665_v3, 0.0  ;;  %v2084_v6 = vpop.f32.mrb[26].mxu0 }
 0x127   : > { %v680_v7 = vadd.f32 %v2084_v6, %v2598_v51  ;;  %v674_v8 = vpop.f32.mrb[27].mxu0 }
 0x128   : > { %2135 = vmatprep.mubr.msk.f32.mxu1 %vm746_vm1, %v727_v5  ;;  %v675_v9 = vadd.f32 %v2598_v51, %v674_v8 }
 0x129   : > { %2136 = vmatmul.mubr.msk.f32.gmra.mrb[24].mxu1 %vm746_vm1, %v728_v4  ;;  %v730_v10 = vmax.f32 %v680_v7, 0.0 }
 0x12a   : > { %v729_v11 = vmax.f32 %v675_v9, 0.0  ;;  %v2087_v12 = vpop.f32.mrb[28].mxu0 }
 0x12b   : > { %v690_v13 = vadd.f32 %v2087_v12, %v2598_v51  ;;  %v684_v14 = vpop.f32.mrb[29].mxu0 }
 0x12c   : > { %2138 = vmatprep.mubr.msk.f32.mxu1 %vm746_vm1, %v729_v11  ;;  %v685_v15 = vadd.f32 %v2598_v51, %v684_v14 }
 0x12d   : > { %2139 = vmatmul.mubr.msk.f32.gmra.mrb[26].mxu1 %vm746_vm1, %v730_v10  ;;  %v732_v16 = vmax.f32 %v690_v13, 0.0 }
 0x12e   : > { %v731_v17 = vmax.f32 %v685_v15, 0.0  ;;  %v2090_v18 = vpop.f32.mrb[30].mxu0 }
 0x12f   : > { %v700_v19 = vadd.f32 %v2090_v18, %v2598_v51  ;;  %v694_v20 = vpop.f32.mrb[31].mxu0 }
 0x130   : > { %2141 = vmatprep.mubr.msk.f32.mxu1 %vm746_vm1, %v731_v17  ;;  %v695_v21 = vadd.f32 %v2598_v51, %v694_v20 }
 0x131   : > { %2142 = vmatmul.mubr.msk.f32.gmra.mrb[28].mxu1 %vm746_vm1, %v732_v16  ;;  %v734_v22 = vmax.f32 %v700_v19, 0.0 }
 0x132   : > { %v733_v23 = vmax.f32 %v695_v21, 0.0 }
 0x134   : > { %2144 = vmatprep.mubr.msk.f32.mxu1 %vm746_vm1, %v733_v23 }
 0x135   : > { %2145 = vmatmul.mubr.msk.f32.gmra.mrb[30].mxu1 %vm746_vm1, %v734_v22 }
 0x1cc   : > { %v2101_v25 = vpop.f32.mrb[0].mxu1 }
 0x1cd   : > { %v915_v26 = vadd.f32 %v2101_v25, %v2673_v24  ;;  %v909_v27 = vpop.f32.mrb[1].mxu1 }
 0x1ce   : > { %v910_v28 = vadd.f32 %v2673_v24, %v909_v27 }
 0x1cf   : > { %v1069_v30 = vmax.f32 %v915_v26, 0.0 }
 0x1d0   : > { %v1068_v51 = vmax.f32 %v910_v28, 0.0  ;;  %v2104_v29 = vpop.f32.mrb[2].mxu1 }
 0x1d1   : > { %v925_v31 = vadd.f32 %v2104_v29, %v2673_v24  ;;  %v919_v32 = vpop.f32.mrb[3].mxu1 }
 0x1d2   : > { %v920_v33 = vadd.f32 %v2673_v24, %v919_v32  ;;  %2155 = vmatprep.mubr.msk.f32.mxu1 %vm746_vm1, %v1068_v51 }
 0x1d3   : > { %2156 = vmatmul.mubr.msk.f32.vlgmr.msra.gmra.mrb[32].mxu1 %vm746_vm1, %v1069_v30  ;;  %v1071_v36 = vmax.f32 %v925_v31, 0.0 }
 0x1d4   : > { %v1070_v34 = vmax.f32 %v920_v33, 0.0  ;;  %v2107_v35 = vpop.f32.mrb[4].mxu1 }
 0x1d5   : > { %v935_v37 = vadd.f32 %v2107_v35, %v2673_v24  ;;  %v929_v38 = vpop.f32.mrb[5].mxu1 }
 0x1d6   : > { %v930_v39 = vadd.f32 %v2673_v24, %v929_v38  ;;  %2158 = vmatprep.mubr.msk.f32.mxu1 %vm746_vm1, %v1070_v34 }
 0x1d7   : > { %2159 = vmatmul.mubr.msk.f32.gmra.mrb[34].mxu1 %vm746_vm1, %v1071_v36  ;;  %v1073_v42 = vmax.f32 %v935_v37, 0.0 }
 0x1d8   : > { %v1072_v40 = vmax.f32 %v930_v39, 0.0  ;;  %v2110_v41 = vpop.f32.mrb[6].mxu1 }
 0x1d9   : > { %v945_v43 = vadd.f32 %v2110_v41, %v2673_v24  ;;  %v939_v44 = vpop.f32.mrb[7].mxu1 }
 0x1da   : > { %v940_v45 = vadd.f32 %v2673_v24, %v939_v44  ;;  %2161 = vmatprep.mubr.msk.f32.mxu1 %vm746_vm1, %v1072_v40 }
 0x1db   : > { %2162 = vmatmul.mubr.msk.f32.gmra.mrb[36].mxu1 %vm746_vm1, %v1073_v42  ;;  %v1075_v48 = vmax.f32 %v945_v43, 0.0 }
 0x1dc   : > { %v1074_v46 = vmax.f32 %v940_v45, 0.0  ;;  %v2113_v47 = vpop.f32.mrb[8].mxu1 }
 0x1dd   : > { %v955_v49 = vadd.f32 %v2113_v47, %v2673_v24  ;;  %v949_v50 = vpop.f32.mrb[9].mxu1 }
 0x1de   : > { %v950_v52 = vadd.f32 %v2673_v24, %v949_v50  ;;  %2164 = vmatprep.mubr.msk.f32.mxu1 %vm746_vm1, %v1074_v46 }
 0x1df   : > { %2165 = vmatmul.mubr.msk.f32.gmra.mrb[38].mxu1 %vm746_vm1, %v1075_v48  ;;  %v1077_v55 = vmax.f32 %v955_v49, 0.0 }
 0x1e0   : > { %v1076_v53 = vmax.f32 %v950_v52, 0.0  ;;  %v2116_v54 = vpop.f32.mrb[10].mxu1 }
 0x1e1   : > { %v965_v56 = vadd.f32 %v2116_v54, %v2673_v24  ;;  %v959_v57 = vpop.f32.mrb[11].mxu1 }
 0x1e2   : > { %v960_v58 = vadd.f32 %v2673_v24, %v959_v57  ;;  %2167 = vmatprep.mubr.msk.f32.mxu1 %vm746_vm1, %v1076_v53 }
 0x1e3   : > { %2168 = vmatmul.mubr.msk.f32.gmra.mrb[40].mxu1 %vm746_vm1, %v1077_v55  ;;  %v1079_v61 = vmax.f32 %v965_v56, 0.0 }
 0x1e4   : > { %v1078_v59 = vmax.f32 %v960_v58, 0.0  ;;  %v2119_v60 = vpop.f32.mrb[12].mxu1  ;;  %v2742_v58 = vld [vmem:[%s2901_s7] sm:$0x1] }
 0x1e5   : > { %v975_v62 = vadd.f32 %v2119_v60, %v2673_v24  ;;  %v969_v63 = vpop.f32.mrb[13].mxu1  ;;  %2029 = vmatprep.mubr.msk.f32.mxu0 %vm746_vm1, %v2742_v58  ;;  %v2385_v60 = vmov 0  }
 0x1e6   : > { %v970_v0 = vadd.f32 %v2673_v24, %v969_v63  ;;  %2170 = vmatprep.mubr.msk.f32.mxu1 %vm746_vm1, %v1078_v59  ;;  %v1465_v59 = vld [vmem:[#allocation2] sm:$0x1]  ;;  %2320 = vset.pattern.permute.xlu0 %v2385_v60 }
 0x1e7   : > { %2171 = vmatmul.mubr.msk.f32.gmra.mrb[42].mxu1 %vm746_vm1, %v1079_v61  ;;  %v1081_v3 = vmax.f32 %v975_v62, 0.0  ;;  %1468 = vperm.xlu0 %2320, %v1465_v59  }
 0x1e8   : > { %v1080_v1 = vmax.f32 %v970_v0, 0.0  ;;  %v2122_v2 = vpop.f32.mrb[14].mxu1 }
 0x1e9   : > { %v985_v4 = vadd.f32 %v2122_v2, %v2673_v24  ;;  %v979_v5 = vpop.f32.mrb[15].mxu1 }
 0x1ea   : > { %v980_v6 = vadd.f32 %v2673_v24, %v979_v5  ;;  %2173 = vmatprep.mubr.msk.f32.mxu1 %vm746_vm1, %v1080_v1 }
 0x1eb   : > { %2174 = vmatmul.mubr.msk.f32.gmra.mrb[44].mxu1 %vm746_vm1, %v1081_v3  ;;  %v1083_v9 = vmax.f32 %v985_v4, 0.0 }
 0x1ec   : > { %v1082_v7 = vmax.f32 %v980_v6, 0.0  ;;  %v2125_v8 = vpop.f32.mrb[16].mxu1 }
 0x1ed   : > { %v995_v10 = vadd.f32 %v2125_v8, %v2673_v24  ;;  %v989_v11 = vpop.f32.mrb[17].mxu1 }
 0x1ee   : > { %v990_v12 = vadd.f32 %v2673_v24, %v989_v11  ;;  %2176 = vmatprep.mubr.msk.f32.mxu1 %vm746_vm1, %v1082_v7 }
 0x1ef   : > { %2177 = vmatmul.mubr.msk.f32.gmra.mrb[46].mxu1 %vm746_vm1, %v1083_v9  ;;  %v1085_v15 = vmax.f32 %v995_v10, 0.0 }
 0x1f0   : > { %v1084_v13 = vmax.f32 %v990_v12, 0.0  ;;  %v2128_v14 = vpop.f32.mrb[18].mxu1 }
 0x1f1   : > { %v1005_v16 = vadd.f32 %v2128_v14, %v2673_v24  ;;  %v999_v17 = vpop.f32.mrb[19].mxu1 }
 0x1f2   : > { %v1000_v18 = vadd.f32 %v2673_v24, %v999_v17  ;;  %2179 = vmatprep.mubr.msk.f32.mxu1 %vm746_vm1, %v1084_v13 }
 0x1f3   : > { %v1087_v19 = vmax.f32 %v1005_v16, 0.0  ;;  %2180 = vmatmul.mubr.msk.f32.gmra.mrb[48].mxu1 %vm746_vm1, %v1085_v15 }
 0x1f4   : > { %v1086_v20 = vmax.f32 %v1000_v18, 0.0  ;;  %v2131_v21 = vpop.f32.mrb[20].mxu1 }
 0x1f5   : > { %v1015_v22 = vadd.f32 %v2131_v21, %v2673_v24  ;;  %v1009_v23 = vpop.f32.mrb[21].mxu1 }
 0x1f6   : > { %2182 = vmatprep.mubr.msk.f32.mxu1 %vm746_vm1, %v1086_v20  ;;  %v1010_v25 = vadd.f32 %v2673_v24, %v1009_v23 }
 0x1f7   : > { %v1089_v26 = vmax.f32 %v1015_v22, 0.0  ;;  %2183 = vmatmul.mubr.msk.f32.gmra.mrb[50].mxu1 %vm746_vm1, %v1087_v19 }
 0x1f8   : > { %v1088_v27 = vmax.f32 %v1010_v25, 0.0  ;;  %v2134_v28 = vpop.f32.mrb[22].mxu1 }
 0x1f9   : > { %v1025_v51 = vadd.f32 %v2134_v28, %v2673_v24  ;;  %v1019_v29 = vpop.f32.mrb[23].mxu1 }
 0x1fa   : > { %2185 = vmatprep.mubr.msk.f32.mxu1 %vm746_vm1, %v1088_v27  ;;  %v1020_v30 = vadd.f32 %v2673_v24, %v1019_v29 }
 0x1fb   : > { %2186 = vmatmul.mubr.msk.f32.gmra.mrb[52].mxu1 %vm746_vm1, %v1089_v26  ;;  %v1091_v31 = vmax.f32 %v1025_v51, 0.0 }
 0x1fc   : > { %v1090_v32 = vmax.f32 %v1020_v30, 0.0  ;;  %v2137_v33 = vpop.f32.mrb[24].mxu1 }
 0x1fd   : > { %v1035_v34 = vadd.f32 %v2137_v33, %v2673_v24  ;;  %v1029_v35 = vpop.f32.mrb[25].mxu1 }
 0x1fe   : > { %2188 = vmatprep.mubr.msk.f32.mxu1 %vm746_vm1, %v1090_v32  ;;  %v1030_v36 = vadd.f32 %v2673_v24, %v1029_v35 }
 0x1ff   : > { %2189 = vmatmul.mubr.msk.f32.gmra.mrb[54].mxu1 %vm746_vm1, %v1091_v31  ;;  %v1093_v37 = vmax.f32 %v1035_v34, 0.0 }
 0x200   : > { %v1092_v38 = vmax.f32 %v1030_v36, 0.0  ;;  %v2140_v39 = vpop.f32.mrb[26].mxu1 }
 0x201   : > { %v1045_v40 = vadd.f32 %v2140_v39, %v2673_v24  ;;  %v1039_v41 = vpop.f32.mrb[27].mxu1 }
 0x202   : > { %2191 = vmatprep.mubr.msk.f32.mxu1 %vm746_vm1, %v1092_v38  ;;  %v1040_v42 = vadd.f32 %v2673_v24, %v1039_v41 }
 0x203   : > { %2192 = vmatmul.mubr.msk.f32.gmra.mrb[56].mxu1 %vm746_vm1, %v1093_v37  ;;  %v1095_v43 = vmax.f32 %v1045_v40, 0.0 }
 0x204   : > { %v1094_v44 = vmax.f32 %v1040_v42, 0.0  ;;  %v2143_v45 = vpop.f32.mrb[28].mxu1 }
 0x205   : > { %v1055_v46 = vadd.f32 %v2143_v45, %v2673_v24  ;;  %v1049_v47 = vpop.f32.mrb[29].mxu1 }
 0x206   : > { %2194 = vmatprep.mubr.msk.f32.mxu1 %vm746_vm1, %v1094_v44  ;;  %v1050_v48 = vadd.f32 %v2673_v24, %v1049_v47 }
 0x207   : > { %2195 = vmatmul.mubr.msk.f32.gmra.mrb[58].mxu1 %vm746_vm1, %v1095_v43  ;;  %v1097_v49 = vmax.f32 %v1055_v46, 0.0 }
 0x208   : > { %v1096_v50 = vmax.f32 %v1050_v48, 0.0  ;;  %v2146_v52 = vpop.f32.mrb[30].mxu1 }
 0x209   : > { %v1065_v53 = vadd.f32 %v2146_v52, %v2673_v24  ;;  %v1059_v54 = vpop.f32.mrb[31].mxu1 }
 0x20a   : > { %2197 = vmatprep.mubr.msk.f32.mxu1 %vm746_vm1, %v1096_v50  ;;  %v1060_v55 = vadd.f32 %v2673_v24, %v1059_v54  ;;  %v2749_v24 = vld [vmem:[%s2900_s6] ss:$0 sm:$0xff] }
 0x20b   : > { %2198 = vmatmul.mubr.msk.f32.gmra.mrb[60].mxu1 %vm746_vm1, %v1097_v49  ;;  %v1099_v56 = vmax.f32 %v1065_v53, 0.0 }
 0x20c   : > { %v1098_v57 = vmax.f32 %v1060_v55, 0.0 }
 0x20e   : > { %2200 = vmatprep.mubr.msk.f32.mxu1 %vm746_vm1, %v1098_v57 }
 0x20f   : > { %2201 = vmatmul.mubr.msk.f32.gmra.mrb[62].mxu1 %vm746_vm1, %v1099_v56 }
 0x2a6   : > { %v2157_v61 = vpop.f32.mrb[32].mxu1 }
 0x2a7   : > { %v1279_v62 = vadd.f32 %v2157_v61, %v2749_v24  ;;  %v1273_v63 = vpop.f32.mrb[33].mxu1 }
 0x2a8   : > { %v1274_v0 = vadd.f32 %v2749_v24, %v1273_v63 }
 0x2a9   : > { %v1433_v1 = vmax.f32 %v1279_v62, 0.0 }
 0x2aa   : > { %v1432_v2 = vmax.f32 %v1274_v0, 0.0  ;;  %v2160_v3 = vpop.f32.mrb[34].mxu1 }
 0x2ab   : > { %v1289_v4 = vadd.f32 %v2160_v3, %v2749_v24  ;;  %v1283_v5 = vpop.f32.mrb[35].mxu1 }
 0x2ac   : > { %v2754_v6 = vpack.c.bf16 %v1433_v1, %v1432_v2  ;;  %v1284_v7 = vadd.f32 %v2749_v24, %v1283_v5 }
 0x2ad   : > { %v1435_v8 = vmax.f32 %v1289_v4, 0.0 }
 0x2ae   : > { %v1434_v9 = vmax.f32 %v1284_v7, 0.0  ;;  %v2163_v10 = vpop.f32.mrb[36].mxu1 }
 0x2af   : > { %v1299_v11 = vadd.f32 %v2163_v10, %v2749_v24  ;;  %v1293_v12 = vpop.f32.mrb[37].mxu1 }
 0x2b0   : > { %v2758_v13 = vpack.c.bf16 %v1435_v8, %v1434_v9  ;;  %v1294_v14 = vadd.f32 %v2749_v24, %v1293_v12 }
 0x2b1   : > { %v1437_v15 = vmax.f32 %v1299_v11, 0.0 }
 0x2b2   : > { %v1436_v16 = vmax.f32 %v1294_v14, 0.0  ;;  %v2166_v17 = vpop.f32.mrb[38].mxu1 }
 0x2b3   : > { %v1309_v18 = vadd.f32 %v2166_v17, %v2749_v24  ;;  %v1303_v19 = vpop.f32.mrb[39].mxu1 }
 0x2b4   : > { %v2762_v20 = vpack.c.bf16 %v1437_v15, %v1436_v16  ;;  %v1304_v21 = vadd.f32 %v2749_v24, %v1303_v19 }
 0x2b5   : > { %v1439_v22 = vmax.f32 %v1309_v18, 0.0 }
 0x2b6   : > { %v1438_v23 = vmax.f32 %v1304_v21, 0.0  ;;  %v2169_v25 = vpop.f32.mrb[40].mxu1 }
 0x2b7   : > { %v1319_v26 = vadd.f32 %v2169_v25, %v2749_v24  ;;  %v1313_v27 = vpop.f32.mrb[41].mxu1 }
 0x2b8   : > { %v2766_v28 = vpack.c.bf16 %v1439_v22, %v1438_v23  ;;  %v1314_v51 = vadd.f32 %v2749_v24, %v1313_v27 }
 0x2b9   : > { %v1441_v29 = vmax.f32 %v1319_v26, 0.0 }
 0x2ba   : > { %v1440_v30 = vmax.f32 %v1314_v51, 0.0  ;;  %v2172_v31 = vpop.f32.mrb[42].mxu1 }
 0x2bb   : > { %v1329_v32 = vadd.f32 %v2172_v31, %v2749_v24  ;;  %v1323_v33 = vpop.f32.mrb[43].mxu1 }
 0x2bc   : > { %v2770_v34 = vpack.c.bf16 %v1441_v29, %v1440_v30  ;;  %v1324_v35 = vadd.f32 %v2749_v24, %v1323_v33 }
 0x2bd   : > { %v1443_v36 = vmax.f32 %v1329_v32, 0.0 }
 0x2be   : > { %v1442_v37 = vmax.f32 %v1324_v35, 0.0  ;;  %v2175_v38 = vpop.f32.mrb[44].mxu1 }
 0x2bf   : > { %v1339_v39 = vadd.f32 %v2175_v38, %v2749_v24  ;;  %v1333_v40 = vpop.f32.mrb[45].mxu1 }
 0x2c0   : > { %v2774_v41 = vpack.c.bf16 %v1443_v36, %v1442_v37  ;;  %v1334_v42 = vadd.f32 %v2749_v24, %v1333_v40 }
 0x2c1   : > { %v1445_v43 = vmax.f32 %v1339_v39, 0.0 }
 0x2c2   : > { %v1444_v44 = vmax.f32 %v1334_v42, 0.0  ;;  %v2178_v45 = vpop.f32.mrb[46].mxu1 }
 0x2c3   : > { %v1349_v46 = vadd.f32 %v2178_v45, %v2749_v24  ;;  %v1343_v47 = vpop.f32.mrb[47].mxu1 }
 0x2c4   : > { %v2778_v48 = vpack.c.bf16 %v1445_v43, %v1444_v44  ;;  %v1344_v49 = vadd.f32 %v2749_v24, %v1343_v47 }
 0x2c5   : > { %v1447_v50 = vmax.f32 %v1349_v46, 0.0 }
 0x2c6   : > { %v1446_v52 = vmax.f32 %v1344_v49, 0.0  ;;  %v2181_v53 = vpop.f32.mrb[48].mxu1 }
 0x2c7   : > { %v1359_v54 = vadd.f32 %v2181_v53, %v2749_v24  ;;  %v1353_v55 = vpop.f32.mrb[49].mxu1  ;;  %v2386_v53 = vmov 1966171168  }
 0x2c8   : > { %v2782_v56 = vpack.c.bf16 %v1447_v50, %v1446_v52  ;;  %v1354_v57 = vadd.f32 %v2749_v24, %v1353_v55 }
 0x2c9   : > { %v1449_v59 = vmax.f32 %v1359_v54, 0.0  ;;  %v1649_v54 = vunpack.c.l.s4 %v2386_v53 }
 0x2ca   : > { %v1448_v60 = vmax.f32 %v1354_v57, 0.0  ;;  %v2184_v61 = vpop.f32.mrb[50].mxu1 }
 0x2cb   : > { %v1369_v62 = vadd.f32 %v2184_v61, %v2749_v24  ;;  %v1363_v63 = vpop.f32.mrb[51].mxu1 }
 0x2cc   : > { %v2231_v1 = vpack.c.bf16 %v1449_v59, %v1448_v60  ;;  %v1364_v2 = vadd.f32 %v2749_v24, %v1363_v63 }
 0x2cd   : > { %v1451_v3 = vmax.f32 %v1369_v62, 0.0 }
 0x2ce   : > { %v1450_v4 = vmax.f32 %v1364_v2, 0.0  ;;  %2233 = vmatprep.subr.msk.bf16.mxu0 %vm2788_vm2, %v2231_v1  ;;  %v2187_v5 = vpop.f32.mrb[52].mxu1 }
 0x2cf   : > { %2236 = vmatpush3.bf16.xpose.msk.msra.mxu0 %vm2788_vm2, %v2754_v6  ;;  %v1379_v7 = vadd.f32 %v2187_v5, %v2749_v24  ;;  %v1373_v8 = vpop.f32.mrb[53].mxu1 }
 0x2d0   : > { %v2237_v9 = vpack.c.bf16 %v1451_v3, %v1450_v4  ;;  %v1374_v10 = vadd.f32 %v2749_v24, %v1373_v8 }
 0x2d1   : > { %v1453_v11 = vmax.f32 %v1379_v7, 0.0 }
 0x2d2   : > { %v1452_v12 = vmax.f32 %v1374_v10, 0.0  ;;  %2239 = vmatprep.subr.msk.bf16.mxu0 %vm2788_vm2, %v2237_v9  ;;  %v2190_v14 = vpop.f32.mrb[54].mxu1 }
 0x2d3   : > { %v1389_v15 = vadd.f32 %v2190_v14, %v2749_v24  ;;  %v1383_v16 = vpop.f32.mrb[55].mxu1 }
 0x2d4   : > { %v2243_v17 = vpack.c.bf16 %v1453_v11, %v1452_v12  ;;  %v1384_v18 = vadd.f32 %v2749_v24, %v1383_v16 }
 0x2d5   : > { %v1455_v19 = vmax.f32 %v1389_v15, 0.0 }
 0x2d6   : > { %v1454_v6 = vmax.f32 %v1384_v18, 0.0  ;;  %v2193_v21 = vpop.f32.mrb[56].mxu1 }
 0x2d7   : > { %2242 = vmatpush3.bf16.xpose.msk.msra.mxu0 %vm2788_vm2, %v2758_v13  ;;  %v1399_v22 = vadd.f32 %v2193_v21, %v2749_v24  ;;  %v1393_v23 = vpop.f32.mrb[57].mxu1 }
 0x2d8   : > { %2245 = vmatprep.subr.msk.bf16.mxu0 %vm2788_vm2, %v2243_v17  ;;  %v2249_v25 = vpack.c.bf16 %v1455_v19, %v1454_v6  ;;  %v1394_v26 = vadd.f32 %v2749_v24, %v1393_v23 }
 0x2d9   : > { %v1457_v27 = vmax.f32 %v1399_v22, 0.0 }
 0x2da   : > { %v1456_v51 = vmax.f32 %v1394_v26, 0.0  ;;  %v2196_v29 = vpop.f32.mrb[58].mxu1 }
 0x2db   : > { %v1409_v30 = vadd.f32 %v2196_v29, %v2749_v24  ;;  %v1403_v31 = vpop.f32.mrb[59].mxu1 }
 0x2dc   : > { %v2255_v32 = vpack.c.bf16 %v1457_v27, %v1456_v51  ;;  %v1404_v33 = vadd.f32 %v2749_v24, %v1403_v31 }
 0x2dd   : > { %v1459_v35 = vmax.f32 %v1409_v30, 0.0 }
 0x2de   : > { %v1458_v13 = vmax.f32 %v1404_v33, 0.0  ;;  %v2199_v36 = vpop.f32.mrb[60].mxu1 }
 0x2df   : > { %2248 = vmatpush3.bf16.xpose.msk.msra.mxu0 %vm2788_vm2, %v2762_v20  ;;  %v1419_v37 = vadd.f32 %v2199_v36, %v2749_v24  ;;  %v1413_v38 = vpop.f32.mrb[61].mxu1 }
 0x2e0   : > { %2251 = vmatprep.subr.msk.bf16.mxu0 %vm2788_vm2, %v2249_v25  ;;  %v2261_v39 = vpack.c.bf16 %v1459_v35, %v1458_v13  ;;  %v1414_v40 = vadd.f32 %v2749_v24, %v1413_v38 }
 0x2e1   : > { %v1461_v42 = vmax.f32 %v1419_v37, 0.0 }
 0x2e2   : > { %v1460_v43 = vmax.f32 %v1414_v40, 0.0  ;;  %v2202_v44 = vpop.f32.mrb[62].mxu1 }
 0x2e3   : > { %v1429_v45 = vadd.f32 %v2202_v44, %v2749_v24  ;;  %v1423_v46 = vpop.f32.mrb[63].mxu1 }
 0x2e4   : > { %v2267_v47 = vpack.c.bf16 %v1461_v42, %v1460_v43  ;;  %v1424_v49 = vadd.f32 %v2749_v24, %v1423_v46  ;;  %v1471_v24 = vlaneseq }
 0x2e5   : > { %v1463_v50 = vmax.f32 %v1429_v45, 0.0 }
 0x2e6   : > { %v1462_v20 = vmax.f32 %v1424_v49, 0.0  ;;  %vm1665_vm3 = vcmp.lt.s32.totalorder %v1471_v24, 256 }
 0x2e7   : > { %2254 = vmatpush3.bf16.xpose.msk.msra.mxu0 %vm2788_vm2, %v2766_v28  ;;  %v1472_v28 = vshrl.u32 %v1471_v24, 7 }
 0x2e8   : > { %2257 = vmatprep.subr.msk.bf16.mxu0 %vm2788_vm2, %v2255_v32  ;;  %v2273_v52 = vpack.c.bf16 %v1463_v50, %v1462_v20 }
 0x2ef   : > { %2260 = vmatpush3.bf16.xpose.msk.msra.mxu0 %vm2788_vm2, %v2770_v34  ;;  %v1473_v34 = vsub.s32 0, %v1472_v28 }
 0x2f0   : > { %2263 = vmatprep.subr.msk.bf16.mxu0 %vm2788_vm2, %v2261_v39 }
 0x2f7   : > { %2266 = vmatpush3.bf16.xpose.msk.msra.mxu0 %vm2788_vm2, %v2774_v41  ;;  %v1469_v41 = vpop.permute.xlu0 %1468 }
 0x2f8   : > { %2269 = vmatprep.subr.msk.bf16.mxu0 %vm2788_vm2, %v2267_v47  ;;  %v1474_v55 = vrot.slane %v1469_v41, %v1473_v34 }
 0x2ff   : > { %2272 = vmatpush3.bf16.xpose.msk.msra.mxu0 %vm2788_vm2, %v2778_v48  ;;  %v1650_v48 = vunpack.c.0.s8 %v1649_v54 }
 0x300   : > { %2275 = vmatprep.subr.msk.bf16.mxu0 %vm2788_vm2, %v2273_v52 }
 0x307   : > { %2278 = vmatpush3.bf16.xpose.msk.msra.mxu0 %vm2788_vm2, %v2782_v56  ;;  %v1653_v56 = vsub.s32 %v1650_v48, %v1472_v28 }
 0x30e   : > { %2030 = vmatmul.mubr.msk.f32.vlgmr.msra.gmra.mrb[32].mxu0 %vm746_vm1, %v2742_v58 }
 0x3e1   : > { %v1640_v57 = vpop.f32.mrb[32].mxu0 }
 0x3e2   : > { %v1641_v59 = vadd.f32 %v1640_v57, %v1474_v55  ;;  %v1642_v60 = vpop.f32.mrb[33].mxu0 }
 0x3e3   : > { %v1643_v61 = vadd.f32 %v1642_v60, %v1474_v55 }
 0x3e5   : > { %v1647_v62 = vcombine.low %v1641_v59, %v1643_v61 }
 0x3e7   : > { %v1654_v58 = vrot.slane %v1647_v62, %v1653_v56 }
 0x3e9   : > { %v1661_v63 = vrot.slane %v1654_v58, %v1653_v56 }
 0x3eb   : > { %1667 = vst.msk [vmem:[%s328_s26] sm:$0x3] %vm1665_vm3, %v1661_v63 }
 0x3ec   : > { %2334 = shalt.err (!%p2331_p3)
}
 0x3ed   : > { %s2335_s28 = scalar_lea.hbm %s2852_s10, 32  ;;  %s2339_s25 = scalar_lea.hbm %s2903_s9, 64 }
 0x3ee   : > { %p2336_p4 = scmp.ne.s32.totalorder %s2852_s10, %s2335_s28  ;;  %p2340_p9 = scmp.lt.u32.totalorder %s2852_s10, %s2903_s9 }
 0x3ef   : > { %p2341_p10 = scmp.lt.u32.totalorder %s2339_s25, %s2335_s28  ;;  %p2343_p12 = scmp.lt.u32.totalorder %s2335_s28, %s2852_s10 }
 0x3f0   : > { %p2337_p7 = pnand %p2336_p4, %p2476_p5 }
 0x3f1   : > { %p2342_p11 = por %p2341_p10, %p2340_p9 }
 0x3f2   : > { %p2338_p8 = pneg %p2337_p7 }
 0x3f3   : > { %p2344_p13 = por %p2343_p12, %p2342_p11 }
 0x3f5   : > { %p2345_p0 = pnand %p2344_p13, %p2338_p8 }
 0x3f7   : > { %2348 = shalt.err (!%p2345_p0)
}
 0x3f8   : > { %2279 = dma.vmem_to_hbm [thread:$0]  (%p2476_p5), %s2854_s27, 32, %s2852_s10, %s1669_s15  }
 0x3f9 PF: > { %p2285_p1 = scmp.ge.s32.totalorder %s2383_s14, 2  ;;  %s1695_s30 = sand.u32 1, %s2371_s11  }
 0x3fa   : > { %s1696_s17 = scalar_lea.sflag [#allocation4], %s1695_s30 }
 0x3fb   : > { %p2282_p2 = pnand %p2285_p1, %p2480_p6 }
 0x3fd   : > { %2366 = dma.done.wait (!%p2282_p2), %s1696_s17, 32  }
 0x3fe   : > { %2368 = vsyncadd (!%p2282_p2), %s1696_s17, 4294967264  ;;  %p21_p3 = scmp.ge.s32.totalorder %s2464_s16, 4   ;;  %s2908_s11 = smov %s2375_s12 }
 0x3ff   : > { %s2909_s12 = smov %s2379_s13  ;;  %s2910_s13 = smov %s2474_s19 }
 0x400   : > { %s2911_s14 = smov %s2464_s16  ;;  %23 = sbr.rel (!%p21_p3) target bundleno = 6 (0x6), region = 91 }
 0x407   :  { %1701 = vsyncpa [#allocation4], 1 }
 0x408   :  { %1703 = vsyncpa [#allocation4 + $0x1], 1 }

</bundles_post_ra>
